<compile_context>
chip_gen: v7x
topology: tpu7x:2x2x1
jax: 0.10.0
libtpu: 0.0.40
codegen_flags: <defaults>
</compile_context>

<pallas_src>
import jax
import jax.numpy as jnp
from jax.experimental import pallas as pl
from jax.experimental.pallas import tpu as pltpu


def _temp_softmax_kernel(inv_t_ref, x_ref, o_ref):
    # inv_t_ref: (1,1) f32 in SMEM; x_ref/o_ref: (row_tile, feat) in VMEM.
    inv_t = inv_t_ref[0, 0]
    # Scale first so semantics match softmax(x / T) for any nonzero T.
    x = x_ref[...].astype(jnp.float32) * inv_t
    m = jnp.max(x, axis=-1, keepdims=True)
    e = jnp.exp(x - m)
    s = jnp.sum(e, axis=-1, keepdims=True)
    # Exact per-row reciprocal (tiny (row_tile,1) divide) then a full-tile mul:
    # exact normalization, negligible cost in this HBM-bound kernel.
    o_ref[...] = (e * (1.0 / s)).astype(o_ref.dtype)


def _vmem_capacity_bytes():
    try:
        return int(pltpu.get_tpu_info().vmem_capacity_bytes)
    except Exception:
        return 64 << 20  # conservative default (v7x per-TC VMEM)


def _choose_row_tile(rows, feat, in_itemsize, vmem_cap):
    # Physical lane-padded width (VMEM footprint), used only for sizing.
    feat_phys = ((feat + 127) // 128) * 128
    row_bytes = max(1, feat_phys * in_itemsize)

    if vmem_cap >= (96 << 20):
        # 128 MiB-VMEM parts (v5e/v6e): larger tiles amortize ~0.35us/step harder.
        target_tile_bytes = 8 << 20
        row_cap = 8192
    else:
        # 64 MiB-VMEM parts (v7x, ~3.2 TB/s HBM): 4-6 MiB tiles keep per-step
        # overhead ~10% while the tighter VMEM budget still fits.
        target_tile_bytes = (6 << 20) if in_itemsize >= 4 else (4 << 20)
        row_cap = 4096

    tile = target_tile_bytes // row_bytes
    tile = max(16, (tile // 16) * 16)   # sublane-friendly multiple of 16 rows
    tile = min(tile, row_cap)

    rows_up = ((rows + 15) // 16) * 16
    if rows_up > 16:
        # Keep >= 2 grid steps so both TensorCores (v7x megacore) get work via
        # the "parallel" grid axis.
        half = ((pl.cdiv(rows_up, 2) + 15) // 16) * 16
        tile = min(tile, max(16, half))
    tile = min(tile, max(16, rows_up))
    return int(tile)


def temperature_scaled_softmax(logits, temperature, *, row_tile=None):
    """softmax(logits / temperature, axis=-1), matching F.softmax(dim=-1)."""
    orig_shape = logits.shape
    feat = orig_shape[-1] if len(orig_shape) else 1
    rows = 1
    for d in orig_shape[:-1]:
        rows *= d
    if rows == 0 or feat == 0:
        return logits

    x2d = logits.reshape(rows, feat)
    in_itemsize = jnp.dtype(logits.dtype).itemsize
    vmem_cap = _vmem_capacity_bytes()

    if row_tile is None:
        row_tile = _choose_row_tile(rows, feat, in_itemsize, vmem_cap)

    # VMEM budget: in + out tiles are double-buffered by the pipeline; the
    # in-kernel f32 temporaries are not, so count them once (+ headroom).
    feat_phys = ((feat + 127) // 128) * 128
    tile_in_bytes = row_tile * feat_phys * in_itemsize
    tile_f32_bytes = row_tile * feat_phys * 4
    vmem_limit = 4 * tile_in_bytes + 2 * tile_f32_bytes + (8 << 20)
    vmem_cap_budget = (96 << 20) if vmem_cap >= (96 << 20) else (48 << 20)
    vmem_limit = int(min(vmem_limit, vmem_cap_budget))

    # Runtime scalar (no recompile per temperature; jit/trace friendly).
    inv_t = (1.0 / jnp.asarray(temperature, dtype=jnp.float32)).reshape(1, 1)

    grid = (pl.cdiv(rows, row_tile),)

    out2d = pl.pallas_call(
        _temp_softmax_kernel,
        out_shape=jax.ShapeDtypeStruct((rows, feat), logits.dtype),
        grid_spec=pltpu.PrefetchScalarGridSpec(
            num_scalar_prefetch=0,
            grid=grid,
            in_specs=[
                pl.BlockSpec(memory_space=pltpu.MemorySpace.SMEM),  # 1/T scalar
                # Last block dim == full feature dim (legal even if % 128 != 0),
                # so no wrapper-side padding or output slicing is needed.
                pl.BlockSpec((row_tile, feat), lambda i: (i, 0)),
            ],
            out_specs=pl.BlockSpec((row_tile, feat), lambda i: (i, 0)),
        ),
        compiler_params=pltpu.CompilerParams(
            dimension_semantics=("parallel",),
            vmem_limit_bytes=vmem_limit,
        ),
        cost_estimate=pl.CostEstimate(
            flops=5 * rows * feat,
            transcendentals=rows * feat,
            bytes_accessed=2 * rows * feat * in_itemsize,
        ),
    )(inv_t, x2d)

    return out2d.reshape(orig_shape)


if __name__ == "__main__":
    key = jax.random.PRNGKey(0)
    # Small shape consistent with the module: (batch=2, seq=8, hidden=32).
    x = jax.random.normal(key, (2, 8, 32), dtype=jnp.float32)
    temperature = 2.5

    out = temperature_scaled_softmax(x, temperature)
    out = jax.block_until_ready(out)

    ref = jax.nn.softmax(x / temperature, axis=-1)
    assert out.shape == x.shape
    assert jnp.allclose(out, ref, atol=1e-5, rtol=1e-5)
    assert jnp.allclose(jnp.sum(out, axis=-1), 1.0, atol=1e-5)

    print("KERNEL_OK")
</pallas_src>

<mosaic_0001>
module attributes {stable_mosaic.version = 11 : i64} {
  func.func @_temp_softmax_kernel(%arg0: i32, %arg1: memref<1x1xf32, #tpu.memory_space<smem>>, %arg2: memref<16x32xf32, #tpu.memory_space<vmem>>, %arg3: memref<16x32xf32, #tpu.memory_space<vmem>>) attributes {dimension_semantics = [#tpu.dimension_semantics<parallel>], iteration_bounds = array<i64: 1>, scalar_prefetch = 0 : i64, scratch_operands = 0 : i64, tpu.core_type = #tpu.core_type<tc>, window_params = [{transform_indices = @transform_0, window_bounds = array<i64: 1, 1>}, {transform_indices = @transform_1, window_bounds = array<i64: 16, 32>}, {transform_indices = @transform_2, window_bounds = array<i64: 16, 32>}]} {
    %c0 = arith.constant 0 : index
    %c0_0 = arith.constant 0 : index
    %0 = memref.load %arg1[%c0, %c0_0] : memref<1x1xf32, #tpu.memory_space<smem>>
    %c0_1 = arith.constant 0 : index
    %c0_2 = arith.constant 0 : index
    %1 = vector.load %arg2[%c0_1, %c0_2] : memref<16x32xf32, #tpu.memory_space<vmem>>, vector<16x32xf32>
    %2 = vector.broadcast %0 : f32 to vector<16x32xf32>
    %3 = arith.mulf %1, %2 : vector<16x32xf32>
    %cst = arith.constant dense<0xFF800000> : vector<16xf32>
    %4 = vector.multi_reduction <maximumf>, %3, %cst [1] : vector<16x32xf32> to vector<16xf32>
    %5 = vector.shape_cast %4 : vector<16xf32> to vector<16x1xf32>
    %6 = vector.broadcast %5 : vector<16x1xf32> to vector<16x32xf32>
    %7 = arith.subf %3, %6 : vector<16x32xf32>
    %8 = math.exp %7 : vector<16x32xf32>
    %cst_3 = arith.constant dense<0.000000e+00> : vector<16xf32>
    %9 = vector.multi_reduction <add>, %8, %cst_3 [1] : vector<16x32xf32> to vector<16xf32>
    %10 = vector.shape_cast %9 : vector<16xf32> to vector<16x1xf32>
    %cst_4 = arith.constant 1.000000e+00 : f32
    %11 = vector.broadcast %cst_4 : f32 to vector<16x1xf32>
    %12 = arith.divf %11, %10 : vector<16x1xf32>
    %13 = vector.broadcast %12 : vector<16x1xf32> to vector<16x32xf32>
    %14 = arith.mulf %8, %13 : vector<16x32xf32>
    %c0_5 = arith.constant 0 : index
    %c0_6 = arith.constant 0 : index
    %15 = vector.load %arg3[%c0_5, %c0_6] : memref<16x32xf32, #tpu.memory_space<vmem>>, vector<16x32xf32>
    tpu.vector_store %arg3[%c0_5, %c0_6], %14 {strides = array<i32>} : memref<16x32xf32, #tpu.memory_space<vmem>>, vector<16x32xf32>,
    return
  }
  func.func @transform_0(%arg0: i32) -> (i32, i32) {
    %c0_i32 = arith.constant 0 : i32
    %c0_i32_0 = arith.constant 0 : i32
    %c0_i32_1 = arith.constant 0 : i32
    return %c0_i32, %c0_i32_0 : i32, i32
  }
  func.func @transform_1(%arg0: i32) -> (i32, i32) {
    %c0_i32 = arith.constant 0 : i32
    %c0_i32_0 = arith.constant 0 : i32
    return %arg0, %c0_i32 : i32, i32
  }
  func.func @transform_2(%arg0: i32) -> (i32, i32) {
    %c0_i32 = arith.constant 0 : i32
    %c0_i32_0 = arith.constant 0 : i32
    return %arg0, %c0_i32 : i32, i32
  }
}

</mosaic_0001>

<bundles_post_ra>
// kernel: tpu_custom_call.1
= control target key start
LH: loop header
LB: loop body
LE: loop exit
PB: predicated region body
PF: predicated region fallthrough
CT: control target
= control target key end

     0   :  { %8 = vsyncpa [#allocation4], 0  ;;  %s195_s0 = inlined_call_operand.<no memory space> [shape: f32[1,1], index: 0, kind: input, shape index: {}]   ;;  %s196_s1 = inlined_call_operand.hbm [shape: f32[16,32], index: 1, kind: input, shape index: {}]   ;;  %s197_s2 = inlined_call_operand.hbm [shape: f32[16,32], index: 2, kind: output, shape index: {}]  }
   0x1   :  { %9 = vsyncpa [#allocation5], 0  ;;  %s137_s9 = smov [#allocation3]   ;;  %s89_s13 = scalar_lea.hbm %s196_s1, 256 }
   0x2   :  { %s17_s10 = sshll.u32 %s137_s9, 4  ;;  %p90_p0 = scmp.ne.s32.totalorder %s196_s1, %s89_s13  ;;  %s18_s10 = int_to_ptr.vmem [resolvable:$true] %s17_s10 }
   0x3   :  { %p93_p1 = scmp.lt.u32.totalorder %s89_s13, %s196_s1 }
   0x5   :  { %p95_p2 = pnand %p93_p1, %p90_p0 }
   0x7   :  { %98 = shalt.err (!%p95_p2)
}
   0x8   :  { %s99_s18 = scalar_lea.vmem %s18_s10, 256  ;;  %p104_p4 = scmp.lt.s32.totalorder %s18_s10, %s18_s10 }
   0x9   :  { %p100_p3 = scmp.ne.s32.totalorder %s18_s10, %s99_s18  ;;  %p105_p5 = scmp.lt.s32.totalorder %s99_s18, %s99_s18 }
   0xb   :  { %p106_p6 = por %p105_p5, %p104_p4 }
   0xd   :  { %p107_p7 = pnand %p106_p6, %p100_p3 }
   0xf   :  { %110 = shalt.err (!%p107_p7)
}
  0x10   :  { %s138_s19 = smov 128   ;;  %s139_s20 = smov 8  }
  0x11   :  { %23 = dma.hbm_to_vmem [thread:$0]  %s196_s1, 256, %s18_s10, [#allocation4], %s138_s19, %s138_s19, %s139_s20  }
  0x12   :  { %133 = dma.done.wait [#allocation4], 256  }
  0x13   :  { %134 = vsyncadd [#allocation4], 4294967040  ;;  %v30_v0 = vstv %s195_s0  ;;  %v28_v1 = vld [vmem:[#allocation3] sm:$0xff]  ;;  %vm33_vm0 = vcmask 261120   ;;  %v29_v2 = vld [vmem:[#allocation3 + $0x8] sm:$0xff]  ;;  %s140_s0 = smov [#allocation6]  }
  0x14   :  { %v31_v3 = vmul.f32 %v30_v0, %v28_v1  ;;  %v32_v4 = vmul.f32 %v30_v0, %v29_v2  ;;  %s65_s1 = sshll.u32 %s140_s0, 4  ;;  %s66_s1 = int_to_ptr.vmem [resolvable:$true] %s65_s1 }
  0x15   :  { %s111_s25 = scalar_lea.vmem %s66_s1, 256  ;;  %p116_p9 = scmp.lt.s32.totalorder %s66_s1, %s66_s1 }
  0x16   :  { %v34_v5 = vsel %vm33_vm0, %v31_v3, -inf  ;;  %v37_v6 = vsel %vm33_vm0, %v32_v4, -inf  ;;  %p112_p8 = scmp.ne.s32.totalorder %s66_s1, %s111_s25  ;;  %p117_p10 = scmp.lt.s32.totalorder %s111_s25, %s111_s25 }
  0x17   :  { %35 = vmax.xlane.f32.xlu0 %v34_v5 }
  0x18   :  { %p118_p11 = por %p117_p10, %p116_p9 }
  0x1a   :  { %p119_p12 = pnand %p118_p11, %p112_p8 }
  0x1b   :  { %38 = vmax.xlane.f32.xlu0 %v37_v6 }
  0xa4   :  { %v36_v7 = vpop.xlane.xlu0 %35 }
  0xa5   :  { %v40_v8 = vsub.f32 %v31_v3, %v36_v7 }
  0xa7   :  { %v42_v9 = vmul.f32 1.442695, %v40_v8 }
  0xa8   :  { %v39_v10 = vpop.xlane.xlu0 %38 }
  0xa9   :  { %81 = vpow2.f32 %v42_v9  ;;  %v41_v11 = vsub.f32 %v32_v4, %v39_v10 }
  0xab   :  { %v44_v12 = vmul.f32 1.442695, %v41_v11 }
  0xad   :  { %83 = vpow2.f32 %v44_v12 }
  0xb3   :  { %v82_v13 = vpop.eup %81 }
  0xb4   :  { %v46_v14 = vsel %vm33_vm0, %v82_v13, 0.0 }
  0xb5   :  { %47 = vadd.xlane.f32.xlu1 %v46_v14 }
  0xb7   :  { %v84_v15 = vpop.eup %83 }
  0xb8   :  { %v49_v16 = vsel %vm33_vm0, %v84_v15, 0.0 }
  0xb9   :  { %50 = vadd.xlane.f32.xlu1 %v49_v16 }
 0x142   :  { %v48_v17 = vpop.xlane.xlu1 %47 }
 0x143   :  { %85 = vrcp.f32 %v48_v17 }
 0x146   :  { %v51_v18 = vpop.xlane.xlu1 %50 }
 0x147   :  { %87 = vrcp.f32 %v51_v18 }
 0x14d   :  { %v86_v19 = vpop.eup %85 }
 0x14e   :  { %v56_v20 = vmul.f32 %v86_v19, %v82_v13 }
 0x150   :  { %58 = vst.msk [vmem:[#allocation6] sm:$0xff] %vm33_vm0, %v56_v20 }
 0x151   :  { %v88_v21 = vpop.eup %87 }
 0x152   :  { %v57_v22 = vmul.f32 %v88_v21, %v84_v15 }
 0x154   :  { %59 = vst.msk [vmem:[#allocation6 + $0x8] sm:$0xff] %vm33_vm0, %v57_v22 }
 0x155   :  { %122 = shalt.err (!%p119_p12)
}
 0x156   :  { %s123_s28 = scalar_lea.hbm %s197_s2, 256 }
 0x157   :  { %p124_p13 = scmp.ne.s32.totalorder %s197_s2, %s123_s28  ;;  %p127_p0 = scmp.lt.u32.totalorder %s123_s28, %s197_s2 }
 0x159   :  { %p129_p1 = pnand %p127_p0, %p124_p13 }
 0x15b   :  { %132 = shalt.err (!%p129_p1)
}
 0x15c   :  { %71 = dma.vmem_to_hbm [thread:$0]  %s66_s1, 256, %s197_s2, [#allocation5], %s138_s19, %s138_s19, %s139_s20  }
 0x15d   :  { %135 = dma.done.wait [#allocation5], 256  }
 0x15e   :  { %136 = vsyncadd [#allocation5], 4294967040 }
 0x15f   :  { %75 = vsyncpa [#allocation4], 1 }
 0x160   :  { %76 = vsyncpa [#allocation5], 1 }

</bundles_post_ra>
